<compile_context>
chip_gen: v6e
topology: v6e:2x2x1
jax: 0.10.0
libtpu: 0.0.40
codegen_flags: <defaults>
</compile_context>

<pallas_src>
import jax
import jax.numpy as jnp
from jax.experimental import pallas as pl
from jax.experimental.pallas import tpu as pltpu

_LANE = 128
_SUBLANE = 8


def _normalize_kernel(x_ref, scale_ref, bias_ref, o_ref):
    # Hot path: out = x * (1/std) + (-mean/std); per-row (channel) stats
    # broadcast across the lane (H*W) axis.  Pure VPU ops, fully hidden under
    # the HBM stall for this bandwidth-bound kernel.
    x = x_ref[...].astype(jnp.float32)
    o_ref[...] = (x * scale_ref[...] + bias_ref[...]).astype(o_ref.dtype)


def _vmem_capacity_bytes():
    """Best-effort physical VMEM query; conservative 64 MiB (v7x) fallback."""
    try:
        info = pltpu.get_tpu_info()
        cap = int(getattr(info, "vmem_capacity_bytes", 0) or 0)
        if cap > 0:
            return cap
    except Exception:
        pass
    return 64 * 1024 * 1024


def _pipelined_footprint_bytes(tr, tc, in_itemsize, out_itemsize):
    # 2 pipeline buffers each for the input and output data tiles, plus the
    # (tr,1) scale/bias operands which are lane-padded to (tr,128) f32 in
    # VMEM (2 operands x 2 buffers).  (We keep them default double-buffered
    # rather than pl.Buffered(1): their footprint is already budgeted here.)
    data = 2 * tr * tc * (in_itemsize + out_itemsize)
    stats = 2 * 2 * tr * _LANE * 4
    return data + stats


def _pick_tiles(rows, cols, in_itemsize, out_itemsize, vmem_bytes):
    """(8,128)-aligned tile caps sized to ~60% of physical VMEM.

    A dim is only taken full-extent when it is <= the cap (always a legal
    block shape); otherwise the aligned cap is used and Pallas masks the edge
    blocks, so non-divisible shapes never inflate the tile.
    """
    budget = int(0.6 * vmem_bytes)
    max_tr, max_tc = 512, 4096            # 512*4096 f32 tile = 8 MiB
    while (_pipelined_footprint_bytes(max_tr, max_tc, in_itemsize, out_itemsize)
           > budget and max_tc > 512):
        max_tc //= 2                      # stays a multiple of 128
    while (_pipelined_footprint_bytes(max_tr, max_tc, in_itemsize, out_itemsize)
           > budget and max_tr > 64):
        max_tr //= 2                      # stays a multiple of 8
    tr = rows if rows <= max_tr else max_tr
    tc = cols if cols <= max_tc else max_tc
    return tr, tc


def normalization_forward(img, mean, std):
    """img: (N, C, H, W); mean/std: (C,).  Returns (img - mean) / std."""
    N, C, H, W = img.shape
    rows, cols = N * C, H * W

    # Match PyTorch promotion: float inputs keep their dtype, integer inputs
    # promote to f32 instead of silently truncating the normalized result.
    out_dtype = img.dtype if jnp.issubdtype(img.dtype, jnp.floating) else jnp.float32

    # Wrapper-side layout plumbing: lane-dense 2-D slab + per-row channel
    # scale/bias columns (reciprocal taken once on the tiny (C,) vector).
    x2d = img.reshape(rows, cols)
    inv_std = 1.0 / std.astype(jnp.float32)
    scale_col = jnp.tile(inv_std, N).reshape(rows, 1)                             # 1/std
    bias_col = jnp.tile(-mean.astype(jnp.float32) * inv_std, N).reshape(rows, 1)  # -mean/std

    in_itemsize = jnp.dtype(img.dtype).itemsize
    out_itemsize = jnp.dtype(out_dtype).itemsize
    vmem_cap = _vmem_capacity_bytes()

    tr, tc = _pick_tiles(rows, cols, in_itemsize, out_itemsize, vmem_cap)
    grid = (pl.cdiv(rows, tr), pl.cdiv(cols, tc))

    # Explicit scoped-VMEM limit from the actual pipelined footprint plus
    # headroom for compiler-internal scratch, clamped to physical VMEM.
    footprint = _pipelined_footprint_bytes(tr, tc, in_itemsize, out_itemsize)
    vmem_limit = min(int(footprint * 1.3) + (4 << 20), vmem_cap)

    # Advisory cost: purely bandwidth-bound (1 mul + 1 add per element).
    cost = pl.CostEstimate(
        flops=2 * rows * cols,
        transcendentals=0,
        bytes_accessed=rows * cols * (in_itemsize + out_itemsize) + 2 * rows * 4,
    )

    out2d = pl.pallas_call(
        _normalize_kernel,
        out_shape=jax.ShapeDtypeStruct((rows, cols), out_dtype),
        grid=grid,
        in_specs=[
            pl.BlockSpec((tr, tc), lambda i, j: (i, j)),
            pl.BlockSpec((tr, 1), lambda i, j: (i, 0)),
            pl.BlockSpec((tr, 1), lambda i, j: (i, 0)),
        ],
        out_specs=pl.BlockSpec((tr, tc), lambda i, j: (i, j)),
        compiler_params=pltpu.CompilerParams(
            dimension_semantics=("parallel", "parallel"),
            vmem_limit_bytes=vmem_limit,
        ),
        cost_estimate=cost,
    )(x2d, scale_col, bias_col)

    return out2d.reshape(N, C, H, W)


if __name__ == "__main__":
    key = jax.random.PRNGKey(0)

    # Deterministic "module parameters" (same role as torch.tensor(mean).view(-1,1,1)).
    C = 4
    mean = jnp.array([0.485, 0.456, 0.406, 0.500], dtype=jnp.float32)  # (C,)
    std = jnp.array([0.229, 0.224, 0.225, 0.250], dtype=jnp.float32)   # (C,)

    # Small NCHW image batch consistent with the module's forward.
    img = jax.random.uniform(key, (2, C, 16, 16), dtype=jnp.float32)

    out = normalization_forward(img, mean, std)
    out = jax.block_until_ready(out)

    # Pure-JAX reference for correctness (mul-by-reciprocal differs from true
    # divide only at the last-ulp level, hence 1e-5 tolerance).
    ref = (img - mean.reshape(-1, 1, 1)) / std.reshape(-1, 1, 1)
    assert out.shape == img.shape and out.dtype == img.dtype
    assert jnp.allclose(out, ref, atol=1e-5, rtol=1e-5)

    print("KERNEL_OK")
</pallas_src>

<mosaic_0001>
module attributes {stable_mosaic.version = 11 : i64} {
  func.func @_normalize_kernel(%arg0: i32, %arg1: i32, %arg2: memref<8x256xf32, #tpu.memory_space<vmem>>, %arg3: memref<8x1xf32, #tpu.memory_space<vmem>>, %arg4: memref<8x1xf32, #tpu.memory_space<vmem>>, %arg5: memref<8x256xf32, #tpu.memory_space<vmem>>) attributes {dimension_semantics = [#tpu.dimension_semantics<parallel>, #tpu.dimension_semantics<parallel>], iteration_bounds = array<i64: 1, 1>, scalar_prefetch = 0 : i64, scratch_operands = 0 : i64, tpu.core_type = #tpu.core_type<tc>, window_params = [{transform_indices = @transform_0, window_bounds = array<i64: 8, 256>}, {transform_indices = @transform_1, window_bounds = array<i64: 8, 1>}, {transform_indices = @transform_2, window_bounds = array<i64: 8, 1>}, {transform_indices = @transform_3, window_bounds = array<i64: 8, 256>}]} {
    %c0 = arith.constant 0 : index
    %c0_0 = arith.constant 0 : index
    %0 = vector.load %arg2[%c0, %c0_0] : memref<8x256xf32, #tpu.memory_space<vmem>>, vector<8x256xf32>
    %c0_1 = arith.constant 0 : index
    %c0_2 = arith.constant 0 : index
    %1 = vector.load %arg3[%c0_1, %c0_2] : memref<8x1xf32, #tpu.memory_space<vmem>>, vector<8x1xf32>
    %2 = vector.broadcast %1 : vector<8x1xf32> to vector<8x256xf32>
    %3 = arith.mulf %0, %2 : vector<8x256xf32>
    %c0_3 = arith.constant 0 : index
    %c0_4 = arith.constant 0 : index
    %4 = vector.load %arg4[%c0_3, %c0_4] : memref<8x1xf32, #tpu.memory_space<vmem>>, vector<8x1xf32>
    %5 = vector.broadcast %4 : vector<8x1xf32> to vector<8x256xf32>
    %6 = arith.addf %3, %5 : vector<8x256xf32>
    %c0_5 = arith.constant 0 : index
    %c0_6 = arith.constant 0 : index
    %7 = vector.load %arg5[%c0_5, %c0_6] : memref<8x256xf32, #tpu.memory_space<vmem>>, vector<8x256xf32>
    tpu.vector_store %arg5[%c0_5, %c0_6], %6 {strides = array<i32>} : memref<8x256xf32, #tpu.memory_space<vmem>>, vector<8x256xf32>,
    return
  }
  func.func @transform_0(%arg0: i32, %arg1: i32) -> (i32, i32) {
    %c0_i32 = arith.constant 0 : i32
    return %arg0, %arg1 : i32, i32
  }
  func.func @transform_1(%arg0: i32, %arg1: i32) -> (i32, i32) {
    %c0_i32 = arith.constant 0 : i32
    %c0_i32_0 = arith.constant 0 : i32
    return %arg0, %c0_i32 : i32, i32
  }
  func.func @transform_2(%arg0: i32, %arg1: i32) -> (i32, i32) {
    %c0_i32 = arith.constant 0 : i32
    %c0_i32_0 = arith.constant 0 : i32
    return %arg0, %c0_i32 : i32, i32
  }
  func.func @transform_3(%arg0: i32, %arg1: i32) -> (i32, i32) {
    %c0_i32 = arith.constant 0 : i32
    return %arg0, %arg1 : i32, i32
  }
}

</mosaic_0001>

<bundles_post_ra>
// kernel: tpu_custom_call.1
= control target key start
LH: loop header
LB: loop body
LE: loop exit
PB: predicated region body
PF: predicated region fallthrough
CT: control target
= control target key end

     0   :  { %v74_v1 = vmov 0   ;;  %s111_s0 = inlined_call_operand.vmem [shape: f32[8,256], index: 0, kind: input, shape index: {}]   ;;  %s112_s1 = inlined_call_operand.vmem [shape: f32[8,1], index: 1, kind: input, shape index: {}]   ;;  %s113_s2 = inlined_call_operand.vmem [shape: f32[8,1], index: 2, kind: input, shape index: {}]   ;;  %s114_s3 = inlined_call_operand.hbm [shape: f32[8,256], index: 3, kind: output, shape index: {}]  }
   0x1   :  { %v17_v0 = vld [vmem:[%s112_s1] sm:$0xff]  ;;  %51 = vset.pattern.permute.xlu0 %v74_v1 }
   0x2   :  { %8 = vsyncpa [#allocation3], 0  ;;  %20 = vperm.xlu0 %51, %v17_v0   ;;  %v25_v2 = vld [vmem:[%s113_s2] sm:$0xff]  ;;  %v16_v5 = vld [vmem:[%s111_s0 + $0x8] sm:$0xff]  ;;  %s75_s20 = smov [#allocation2]  }
   0x3   :  { %v15_v4 = vld [vmem:[%s111_s0] sm:$0xff]  ;;  %s41_s1 = sshll.u32 %s75_s20, 4  ;;  %s42_s1 = int_to_ptr.vmem [resolvable:$true] %s41_s1 }
   0x4   :  { %s52_s2 = scalar_lea.vmem %s42_s1, 256  ;;  %p57_p1 = scmp.lt.s32.totalorder %s42_s1, %s42_s1 }
   0x5   :  { %p53_p0 = scmp.ne.s32.totalorder %s42_s1, %s52_s2  ;;  %p58_p2 = scmp.lt.s32.totalorder %s52_s2, %s52_s2 }
   0x6   :  { %28 = vperm.xlu0 %51, %v25_v2  }
   0x7   :  { %p59_p3 = por %p58_p2, %p57_p1 }
   0x9   :  { %p60_p4 = pnand %p59_p3, %p53_p0 }
  0x7d   :  { %v21_v3 = vpop.permute.xlu0 %20 }
  0x7e   :  { %v23_v6 = vmul.f32 %v21_v3, %v15_v4  ;;  %v24_v7 = vmul.f32 %v21_v3, %v16_v5 }
  0x81   :  { %v29_v8 = vpop.permute.xlu0 %28 }
  0x82   :  { %v31_v9 = vadd.f32 %v29_v8, %v23_v6  ;;  %v32_v10 = vadd.f32 %v29_v8, %v24_v7 }
  0x84   :  { %33 = vst [vmem:[#allocation2] sm:$0xff] %v31_v9  ;;  %34 = vst [vmem:[#allocation2 + $0x8] sm:$0xff] %v32_v10 }
  0x85   :  { %63 = shalt.err (!%p60_p4)
}
  0x86   :  { %44 = dma.vmem_to_hbm [thread:$0]  %s42_s1, 256, %s114_s3, [#allocation3]  }
  0x87   :  { %72 = dma.done.wait [#allocation3], 256  }
  0x88   :  { %73 = vsyncadd [#allocation3], 4294967040 }
  0x89   :  { %48 = vsyncpa [#allocation3], 1 }

</bundles_post_ra>
